<compile_context>
chip_gen: v7x
topology: tpu7x:2x2x1
jax: 0.10.0
libtpu: 0.0.40
codegen_flags: <defaults>
</compile_context>

<pallas_src>
import functools

import jax
import jax.numpy as jnp
from jax.experimental import pallas as pl
from jax.experimental.pallas import tpu as pltpu


def _round_up(x, m):
    return (x + m - 1) // m * m


def _resident_spec(block_shape):
    """Constant-index_map VMEM block; single-buffered where supported (saves VMEM)."""
    try:
        return pl.BlockSpec(block_shape, lambda i: (0, 0), pipeline_mode=pl.Buffered(1))
    except (TypeError, AttributeError):
        return pl.BlockSpec(block_shape, lambda i: (0, 0))


def _baseline_kernel(idx_ref, h1_ref, h2_ref, w2_ref, b2_ref, o_ref):
    # idx_ref : (2, TB)     int32  pair drug indices for this batch tile (lane-dense)
    # h1_ref  : (Hp, NDp)   bf16   (x_drugs @ w1[:F] + b1)^T, VMEM-resident
    # h2_ref  : (Hp, NDp)   bf16   (x_drugs @ w1[F:])^T,      VMEM-resident
    # w2_ref  : (Hp, 1)     f32    second-layer weight column
    # b2_ref  : (1, 1)      f32    second-layer bias (SMEM scalar)
    # o_ref   : (1, TB)     f32    lane-dense output row
    idx = idx_ref[...]                                        # (2, TB)
    nd = h1_ref.shape[1]
    tb = idx.shape[1]

    # One-hot gather masks on the MXU-friendly (ND, TB) layout.
    drug_iota = jax.lax.broadcasted_iota(jnp.int32, (nd, tb), 0)
    oh1 = (idx[0:1, :] == drug_iota).astype(h1_ref.dtype)     # (ND, TB) bf16
    oh2 = (idx[1:2, :] == drug_iota).astype(h2_ref.dtype)     # (ND, TB) bf16

    # Layer 1 (gather + matmul + bias, fused): h^T = H1^T[:, i1] + H2^T[:, i2].
    hT = (jnp.dot(h1_ref[...], oh1, preferred_element_type=jnp.float32)
          + jnp.dot(h2_ref[...], oh2, preferred_element_type=jnp.float32))  # (Hp, TB) f32
    hT = jnp.maximum(hT, 0.0)                                 # ReLU (VPU, f32)

    # Layer 2 (N=1): VPU multiply + sublane (XLU) reduction; MXU stays free.
    out = jnp.sum(hT * w2_ref[...], axis=0, keepdims=True) + b2_ref[0, 0]   # (1, TB)
    o_ref[...] = out.astype(o_ref.dtype)


@functools.partial(jax.jit, static_argnames=("tile_b",))
def baseline_predict(x_drugs, pair_idx, w1, b1, w2, b2, *, tile_b=256):
    """Baseline forward: per-pair MLP synergy prediction.

    x_drugs : (n_drugs, F) f32   drug feature matrix (data.x_drugs)
    pair_idx: (B, 2)       int32 drug indices per combination (drug_drug_batch[0])
    w1      : (2F, H), b1: (1, H), w2: (H, 1), b2: (1, 1)
    returns : (B, 1) f32 predicted synergy scores
    """
    n_drugs, F = x_drugs.shape
    B = pair_idx.shape[0]
    H = w1.shape[1]

    # Reassociated layer-1 tables (once per call, amortized over all batch tiles).
    # (oh @ x_drugs) @ w1a == oh @ (x_drugs @ w1a); bias folds into the drug-1 half.
    h1 = x_drugs @ w1[:F] + b1.reshape(1, H)                  # (ND, H) f32
    h2 = x_drugs @ w1[F:]                                     # (ND, H) f32

    # Pad ND and H to vreg/MXU-friendly multiples; transpose for the lane-dense layout.
    nd_p = _round_up(max(n_drugs, 128), 128)
    h_p = _round_up(max(H, 128), 128)
    h1t = jnp.zeros((h_p, nd_p), jnp.bfloat16).at[:H, :n_drugs].set(h1.T.astype(jnp.bfloat16))
    h2t = jnp.zeros((h_p, nd_p), jnp.bfloat16).at[:H, :n_drugs].set(h2.T.astype(jnp.bfloat16))
    w2c = jnp.zeros((h_p, 1), jnp.float32).at[:H].set(w2.reshape(H, 1).astype(jnp.float32))
    b2s = b2.reshape(1, 1).astype(jnp.float32)

    # Batch tiling: lane-dense (2, TB) index tiles, TB a multiple of 128.
    tb = _round_up(min(tile_b, _round_up(B, 128)), 128)
    bp = _round_up(B, tb)
    if bp // tb < 2 and tb > 128:
        # Prefer >= 2 tiles so v7x's two TensorCores both get work (no-op on v5e/v6e).
        tb = _round_up(tb // 2, 128)
        bp = _round_up(B, tb)
    idx = jnp.zeros((2, bp), jnp.int32).at[:, :B].set(pair_idx.astype(jnp.int32).T)

    num_tiles = bp // tb
    grid = (num_tiles,)

    # Explicit VMEM budget: resident tables (single-buffered) + tile buffers + temps.
    resident_bytes = h1t.size * 2 + h2t.size * 2 + w2c.size * 4
    tile_bytes = (2 * (2 * tb * 4)          # idx tile, double-buffered
                  + 2 * (tb * 4)            # out tile, double-buffered
                  + 2 * nd_p * tb * 2       # one-hot intermediates (bf16)
                  + 2 * h_p * tb * 4)       # hidden tile + temps (f32)
    vmem_limit = int(min(64 * 1024 * 1024,
                         max(32 * 1024 * 1024, 2 * (resident_bytes + tile_bytes))))

    flops = 4 * h_p * nd_p * bp + 4 * h_p * bp
    bytes_accessed = (idx.size * 4 + h1t.size * 2 + h2t.size * 2
                      + w2c.size * 4 + b2s.size * 4 + bp * 4)

    out = pl.pallas_call(
        _baseline_kernel,
        out_shape=jax.ShapeDtypeStruct((1, bp), jnp.float32),
        grid=grid,
        in_specs=[
            pl.BlockSpec((2, tb), lambda i: (0, i)),          # pair indices: tiled over B
            _resident_spec((h_p, nd_p)),                      # H1 table: VMEM-resident
            _resident_spec((h_p, nd_p)),                      # H2 table: VMEM-resident
            _resident_spec((h_p, 1)),                         # w2 column: VMEM-resident
            pl.BlockSpec(memory_space=pltpu.MemorySpace.SMEM),  # b2 scalar
        ],
        out_specs=pl.BlockSpec((1, tb), lambda i: (0, i)),    # lane-dense output row
        compiler_params=pltpu.CompilerParams(
            dimension_semantics=("parallel",),
            vmem_limit_bytes=vmem_limit,
        ),
        cost_estimate=pl.CostEstimate(
            flops=flops, transcendentals=0, bytes_accessed=bytes_accessed),
    )(idx, h1t, h2t, w2c, b2s)
    return out[0, :B][:, None]


def mse_loss(output, ground_truth):
    # Baseline.loss: MSE between predictions and drug_drug_batch[2][:, None]
    return jnp.mean((output - ground_truth[:, None]) ** 2)


if __name__ == "__main__":
    key = jax.random.PRNGKey(0)
    k_feat, k_idx, k_w1, k_b1, k_w2, k_b2, k_gt = jax.random.split(key, 7)

    # Small deterministic synthetic problem.
    n_drugs = 4      # number of drugs in data.x_drugs
    F = 16           # drug feature dimension (data.x_drugs.shape[1])
    H = 32           # config['predictor_layers'][0]
    B = 8            # drug-drug batch size
    # predictor_layers = [2F, H, 1]  (last layer == 1, as asserted in Baseline)

    x_drugs = jax.random.normal(k_feat, (n_drugs, F), dtype=jnp.float32)
    pair_idx = jax.random.randint(k_idx, (B, 2), 0, n_drugs, dtype=jnp.int32)
    ground_truth = jax.random.normal(k_gt, (B,), dtype=jnp.float32)

    w1 = jax.random.normal(k_w1, (2 * F, H), dtype=jnp.float32) * 0.1
    b1 = jax.random.normal(k_b1, (1, H), dtype=jnp.float32) * 0.01
    w2 = jax.random.normal(k_w2, (H, 1), dtype=jnp.float32) * 0.1
    b2 = jax.random.normal(k_b2, (1, 1), dtype=jnp.float32) * 0.01

    out = jax.block_until_ready(baseline_predict(x_drugs, pair_idx, w1, b1, w2, b2))
    assert out.shape == (B, 1)

    # Reference: same math, with the reassociated tables rounded to bf16 at the same
    # point as the kernel (one-hot row selection and all remaining work are exact f32).
    h1_ref = (x_drugs @ w1[:F] + b1).astype(jnp.bfloat16).astype(jnp.float32)
    h2_ref = (x_drugs @ w1[F:]).astype(jnp.bfloat16).astype(jnp.float32)
    h = jnp.maximum(h1_ref[pair_idx[:, 0]] + h2_ref[pair_idx[:, 1]], 0.0)
    ref = jnp.sum(h * w2.reshape(1, H), axis=-1, keepdims=True) + b2
    assert jnp.allclose(out, ref, atol=1e-3, rtol=1e-3), (out, ref)

    # Exercise the loss path (plain JAX glue, matches torch.nn.MSELoss).
    loss = jax.block_until_ready(mse_loss(out, ground_truth))

    print("KERNEL_OK")
</pallas_src>

<mosaic_0001>
module attributes {stable_mosaic.version = 11 : i64} {
  func.func @_baseline_kernel(%arg0: i32, %arg1: memref<2x128xi32, #tpu.memory_space<vmem>>, %arg2: memref<128x128xbf16, #tpu.memory_space<vmem>>, %arg3: memref<128x128xbf16, #tpu.memory_space<vmem>>, %arg4: memref<128x1xf32, #tpu.memory_space<vmem>>, %arg5: memref<1x1xf32, #tpu.memory_space<smem>>, %arg6: memref<1x128xf32, #tpu.memory_space<vmem>>) attributes {dimension_semantics = [#tpu.dimension_semantics<parallel>], iteration_bounds = array<i64: 1>, scalar_prefetch = 0 : i64, scratch_operands = 0 : i64, tpu.core_type = #tpu.core_type<tc>, window_params = [{transform_indices = @transform_0, window_bounds = array<i64: 2, 128>}, {pipeline_mode = #tpu.pipeline_mode<synchronous>, transform_indices = @transform_1, window_bounds = array<i64: 128, 128>}, {pipeline_mode = #tpu.pipeline_mode<synchronous>, transform_indices = @transform_2, window_bounds = array<i64: 128, 128>}, {pipeline_mode = #tpu.pipeline_mode<synchronous>, transform_indices = @transform_3, window_bounds = array<i64: 128, 1>}, {transform_indices = @transform_4, window_bounds = array<i64: 1, 1>}, {transform_indices = @transform_5, window_bounds = array<i64: 1, 128>}]} {
    %c0 = arith.constant 0 : index
    %c0_0 = arith.constant 0 : index
    %0 = vector.load %arg1[%c0, %c0_0] : memref<2x128xi32, #tpu.memory_space<vmem>>, vector<2x128xi32>
    %1 = tpu.iota {dimensions = array<i32: 0>} : vector<128x128xi32>
    %2 = vector.extract_strided_slice %0 {offsets = [0, 0], sizes = [1, 128], strides = [1, 1]} : vector<2x128xi32> to vector<1x128xi32>
    %3 = vector.broadcast %2 : vector<1x128xi32> to vector<128x128xi32>
    %4 = arith.cmpi eq, %3, %1 : vector<128x128xi32>
    %5 = arith.extui %4 : vector<128x128xi1> to vector<128x128xi32>
    %6 = arith.sitofp %5 : vector<128x128xi32> to vector<128x128xf32>
    %7 = arith.truncf %6 : vector<128x128xf32> to vector<128x128xbf16>
    %8 = vector.extract_strided_slice %0 {offsets = [1, 0], sizes = [1, 128], strides = [1, 1]} : vector<2x128xi32> to vector<1x128xi32>
    %9 = vector.broadcast %8 : vector<1x128xi32> to vector<128x128xi32>
    %10 = arith.cmpi eq, %9, %1 : vector<128x128xi32>
    %11 = arith.extui %10 : vector<128x128xi1> to vector<128x128xi32>
    %12 = arith.sitofp %11 : vector<128x128xi32> to vector<128x128xf32>
    %13 = arith.truncf %12 : vector<128x128xf32> to vector<128x128xbf16>
    %c0_1 = arith.constant 0 : index
    %c0_2 = arith.constant 0 : index
    %14 = vector.load %arg2[%c0_1, %c0_2] : memref<128x128xbf16, #tpu.memory_space<vmem>>, vector<128x128xbf16>
    %cst = arith.constant dense<0.000000e+00> : vector<128x128xf32>
    %15 = tpu.matmul %14, %7, %cst {dimension_numbers = #tpu.dot_dimension_numbers<[1], [0], [0], [1], [0, 0, 1, 1], [], []>} : vector<128x128xbf16>, vector<128x128xbf16>, vector<128x128xf32> -> vector<128x128xf32>
    %c0_3 = arith.constant 0 : index
    %c0_4 = arith.constant 0 : index
    %16 = vector.load %arg3[%c0_3, %c0_4] : memref<128x128xbf16, #tpu.memory_space<vmem>>, vector<128x128xbf16>
    %cst_5 = arith.constant dense<0.000000e+00> : vector<128x128xf32>
    %17 = tpu.matmul %16, %13, %cst_5 {dimension_numbers = #tpu.dot_dimension_numbers<[1], [0], [0], [1], [0, 0, 1, 1], [], []>} : vector<128x128xbf16>, vector<128x128xbf16>, vector<128x128xf32> -> vector<128x128xf32>
    %18 = arith.addf %15, %17 : vector<128x128xf32>
    %cst_6 = arith.constant 0.000000e+00 : f32
    %19 = vector.broadcast %cst_6 : f32 to vector<128x128xf32>
    %20 = arith.maximumf %18, %19 : vector<128x128xf32>
    %c0_7 = arith.constant 0 : index
    %c0_8 = arith.constant 0 : index
    %21 = vector.load %arg4[%c0_7, %c0_8] : memref<128x1xf32, #tpu.memory_space<vmem>>, vector<128x1xf32>
    %22 = vector.broadcast %21 : vector<128x1xf32> to vector<128x128xf32>
    %23 = arith.mulf %20, %22 : vector<128x128xf32>
    %cst_9 = arith.constant dense<0.000000e+00> : vector<128xf32>
    %24 = vector.multi_reduction <add>, %23, %cst_9 [0] : vector<128x128xf32> to vector<128xf32>
    %25 = vector.shape_cast %24 : vector<128xf32> to vector<1x128xf32>
    %c0_10 = arith.constant 0 : index
    %c0_11 = arith.constant 0 : index
    %26 = memref.load %arg5[%c0_10, %c0_11] : memref<1x1xf32, #tpu.memory_space<smem>>
    %27 = vector.broadcast %26 : f32 to vector<1x128xf32>
    %28 = arith.addf %25, %27 : vector<1x128xf32>
    %c0_12 = arith.constant 0 : index
    %c0_13 = arith.constant 0 : index
    %29 = vector.load %arg6[%c0_12, %c0_13] : memref<1x128xf32, #tpu.memory_space<vmem>>, vector<1x128xf32>
    tpu.vector_store %arg6[%c0_12, %c0_13], %28 {strides = array<i32>} : memref<1x128xf32, #tpu.memory_space<vmem>>, vector<1x128xf32>,
    return
  }
  func.func @transform_0(%arg0: i32) -> (i32, i32) {
    %c0_i32 = arith.constant 0 : i32
    %c0_i32_0 = arith.constant 0 : i32
    return %c0_i32, %arg0 : i32, i32
  }
  func.func @transform_1(%arg0: i32) -> (i32, i32) {
    %c0_i32 = arith.constant 0 : i32
    %c0_i32_0 = arith.constant 0 : i32
    %c0_i32_1 = arith.constant 0 : i32
    return %c0_i32, %c0_i32_0 : i32, i32
  }
  func.func @transform_2(%arg0: i32) -> (i32, i32) {
    %c0_i32 = arith.constant 0 : i32
    %c0_i32_0 = arith.constant 0 : i32
    %c0_i32_1 = arith.constant 0 : i32
    return %c0_i32, %c0_i32_0 : i32, i32
  }
  func.func @transform_3(%arg0: i32) -> (i32, i32) {
    %c0_i32 = arith.constant 0 : i32
    %c0_i32_0 = arith.constant 0 : i32
    %c0_i32_1 = arith.constant 0 : i32
    return %c0_i32, %c0_i32_0 : i32, i32
  }
  func.func @transform_4(%arg0: i32) -> (i32, i32) {
    %c0_i32 = arith.constant 0 : i32
    %c0_i32_0 = arith.constant 0 : i32
    %c0_i32_1 = arith.constant 0 : i32
    return %c0_i32, %c0_i32_0 : i32, i32
  }
  func.func @transform_5(%arg0: i32) -> (i32, i32) {
    %c0_i32 = arith.constant 0 : i32
    %c0_i32_0 = arith.constant 0 : i32
    return %c0_i32, %arg0 : i32, i32
  }
}

</mosaic_0001>

<bundles_post_ra>
// kernel: baseline_predict.1
= control target key start
LH: loop header
LB: loop body
LE: loop exit
PB: predicated region body
PF: predicated region fallthrough
CT: control target
= control target key end

     0   :  { %v23_v0 = vlaneseq  ;;  %v851_v2 = vmov 0   ;;  %v852_v15 = vmov 1.0|1.0   ;;  %s1169_s0 = inlined_call_operand.vmem [shape: s32[2,128], index: 0, kind: input, shape index: {}]   ;;  %s1170_s2 = inlined_call_operand.vmem [shape: bf16[128,128], index: 2, kind: input, shape index: {}]   ;;  %s1171_s1 = inlined_call_operand.vmem [shape: bf16[128,128], index: 1, kind: input, shape index: {}]   ;;  %s1172_s3 = inlined_call_operand.vmem [shape: f32[128,1], index: 3, kind: input, shape index: {}]   ;;  %s1173_s4 = inlined_call_operand.<no memory space> [shape: f32[1,1], index: 4, kind: input, shape index: {}]   ;;  %s1174_s5 = inlined_call_operand.vmem [shape: f32[1,128], index: 5, kind: output, shape index: {}]  }
   0x1   :  { %v22_v1 = vld [vmem:[%s1169_s0] sm:$0x3]  ;;  %833 = vset.pattern.permute.xlu0 %v851_v2  ;;  %834 = vset.pattern.permute.xlu1 %v851_v2  ;;  %v500_v32 = vld [vmem:[%s1172_s3 + $0x10] sm:$0xff]  ;;  %v499_v36 = vld [vmem:[%s1172_s3 + $0x8] sm:$0xff] }
   0x2   :  { %v886_v3 = vshrl.u32 %v23_v0, 7  ;;  %v835_v4 = vld [vmem:[%s1170_s2] sm:$0xff]   ;;  %526 = vperm.xlu1 %834, %v500_v32   ;;  %v501_v37 = vld [vmem:[%s1172_s3 + $0x18] sm:$0xff]  ;;  %v503_v41 = vld [vmem:[%s1172_s3 + $0x28] sm:$0xff] }
   0x3   :  { %v836_v5 = vld [vmem:[%s1171_s1] sm:$0xff]   ;;  %767 = vmatprep.mubr.bf16.mxu1 %v835_v4  ;;  %v504_v43 = vld [vmem:[%s1172_s3 + $0x30] sm:$0xff]  ;;  %v505_v44 = vld [vmem:[%s1172_s3 + $0x38] sm:$0xff] }
   0x4   :  { %v25_v6 = vadd.s32 8, %v886_v3  ;;  %v102_v7 = vsub.s32 1, %v886_v3  ;;  %v42_v8 = vsub.s32 0, %v886_v3  ;;  %v26_v9 = vadd.s32 16, %v886_v3  ;;  %799 = vmatprep.mubr.bf16.mxu0 %v836_v5  ;;  %v498_v30 = vld [vmem:[%s1172_s3] sm:$0xff]  ;;  %v837_v45 = vld [vmem:[%s1170_s2 + $0x8] sm:$0xff]  }
   0x5   :  { %v27_v10 = vadd.s32 24, %v886_v3  ;;  %v28_v13 = vadd.s32 32, %v886_v3  ;;  %v29_v14 = vadd.s32 40, %v886_v3  ;;  %v30_v16 = vadd.s32 48, %v886_v3  ;;  %516 = vperm.xlu0 %833, %v498_v30   ;;  %v502_v40 = vld [vmem:[%s1172_s3 + $0x20] sm:$0xff]  ;;  %v838_v47 = vld [vmem:[%s1171_s1 + $0x8] sm:$0xff]  }
   0x6   :  { %v899_v11 = vrot.slane %v22_v1, %v102_v7  ;;  %v901_v12 = vrot.slane %v22_v1, %v42_v8  ;;  %v31_v17 = vadd.s32 56, %v886_v3  ;;  %v32_v20 = vadd.s32 64, %v886_v3  ;;  %531 = vperm.xlu1 %834, %v501_v37   ;;  %v506_v46 = vld [vmem:[%s1172_s3 + $0x40] sm:$0xff]  ;;  %v839_v48 = vld [vmem:[%s1170_s2 + $0x10] sm:$0xff]   ;;  %v507_v49 = vld [vmem:[%s1172_s3 + $0x48] sm:$0xff] }
   0x7   :  { %v33_v21 = vadd.s32 72, %v886_v3  ;;  %v34_v24 = vadd.s32 80, %v886_v3  ;;  %v35_v25 = vadd.s32 88, %v886_v3  ;;  %v36_v28 = vadd.s32 96, %v886_v3  ;;  %v840_v50 = vld [vmem:[%s1171_s1 + $0x10] sm:$0xff]   ;;  %v509_v52 = vld [vmem:[%s1172_s3 + $0x58] sm:$0xff] }
   0x8   :  { %vm104_vm0 = vcmp.eq.s32.totalorder %v899_v11, %v886_v3  ;;  %vm105_vm1 = vcmp.eq.s32.totalorder %v899_v11, %v25_v6  ;;  %vm44_vm2 = vcmp.eq.s32.totalorder %v901_v12, %v886_v3  ;;  %vm45_vm3 = vcmp.eq.s32.totalorder %v901_v12, %v25_v6  ;;  %v508_v51 = vld [vmem:[%s1172_s3 + $0x50] sm:$0xff]  ;;  %v841_v53 = vld [vmem:[%s1170_s2 + $0x18] sm:$0xff]   ;;  %v510_v54 = vld [vmem:[%s1172_s3 + $0x60] sm:$0xff] }
   0x9   :  { %vm679_vm4 = vmpackc.low %vm105_vm1, %vm104_vm0  ;;  %vm106_vm5 = vcmp.eq.s32.totalorder %v899_v11, %v26_v9  ;;  %vm107_vm6 = vcmp.eq.s32.totalorder %v899_v11, %v27_v10  ;;  %vm46_vm7 = vcmp.eq.s32.totalorder %v901_v12, %v26_v9  ;;  %vm47_vm8 = vcmp.eq.s32.totalorder %v901_v12, %v27_v10  ;;  %521 = vperm.xlu0 %833, %v499_v36   ;;  %v842_v55 = vld [vmem:[%s1171_s1 + $0x18] sm:$0xff]   ;;  %v843_v56 = vld [vmem:[%s1170_s2 + $0x20] sm:$0xff]  }
   0xa   :  { %751 = vmatprep.subr.msk.bf16.mxu1 %vm679_vm4, %v852_v15  ;;  %vm703_vm9 = vmpackc.low %vm45_vm3, %vm44_vm2  ;;  %vm108_vm10 = vcmp.eq.s32.totalorder %v899_v11, %v28_v13  ;;  %vm109_vm11 = vcmp.eq.s32.totalorder %v899_v11, %v29_v14  ;;  %vm48_vm13 = vcmp.eq.s32.totalorder %v901_v12, %v28_v13  ;;  %vm49_vm14 = vcmp.eq.s32.totalorder %v901_v12, %v29_v14  ;;  %v511_v57 = vld [vmem:[%s1172_s3 + $0x68] sm:$0xff]  ;;  %v844_v58 = vld [vmem:[%s1171_s1 + $0x20] sm:$0xff]  }
   0xb   :  { %783 = vmatprep.subr.msk.bf16.mxu0 %vm703_vm9, %v852_v15  ;;  %752 = vmatpush3.bf16.msk.msra.mxu1 %vm679_vm4, %v852_v15  ;;  %vm681_vm12 = vmpackc.low %vm107_vm6, %vm106_vm5  ;;  %vm110_vm2 = vcmp.eq.s32.totalorder %v899_v11, %v30_v16  ;;  %vm111_vm3 = vcmp.eq.s32.totalorder %v899_v11, %v31_v17  ;;  %vm50_vm4 = vcmp.eq.s32.totalorder %v901_v12, %v30_v16  ;;  %v37_v29 = vadd.s32 104, %v886_v3  ;;  %v512_v59 = vld [vmem:[%s1172_s3 + $0x70] sm:$0xff]  ;;  %v513_v60 = vld [vmem:[%s1172_s3 + $0x78] sm:$0xff] }
   0xc   :  { %784 = vmatpush3.bf16.msk.msra.mxu0 %vm703_vm9, %v852_v15  ;;  %753 = vmatprep.subr.msk.bf16.mxu1 %vm681_vm12, %v852_v15  ;;  %vm705_vm15 = vmpackc.low %vm47_vm8, %vm46_vm7  ;;  %vm51_vm5 = vcmp.eq.s32.totalorder %v901_v12, %v31_v17  ;;  %vm112_vm8 = vcmp.eq.s32.totalorder %v899_v11, %v32_v20  ;;  %vm113_vm9 = vcmp.eq.s32.totalorder %v899_v11, %v33_v21  ;;  %v38_v34 = vadd.s32 112, %v886_v3  ;;  %v845_v61 = vld [vmem:[%s1170_s2 + $0x28] sm:$0xff]   ;;  %v847_v63 = vld [vmem:[%s1170_s2 + $0x30] sm:$0xff]  }
   0xd   :  { %785 = vmatprep.subr.msk.bf16.mxu0 %vm705_vm15, %v852_v15  ;;  %vm931_vm0 = vmpackc.low %vm109_vm11, %vm108_vm10  ;;  %vm52_vm10 = vcmp.eq.s32.totalorder %v901_v12, %v32_v20  ;;  %vm53_vm11 = vcmp.eq.s32.totalorder %v901_v12, %v33_v21  ;;  %v39_v35 = vadd.s32 120, %v886_v3  ;;  %536 = vperm.xlu0 %833, %v502_v40   ;;  %v846_v62 = vld [vmem:[%s1171_s1 + $0x28] sm:$0xff]   ;;  %v848_v0 = vld [vmem:[%s1171_s1 + $0x30] sm:$0xff]  }
   0xe   :  { %vm935_vm1 = vmpackc.low %vm49_vm14, %vm48_vm13  ;;  %vm114_vm14 = vcmp.eq.s32.totalorder %v899_v11, %v34_v24  ;;  %541 = vperm.xlu1 %834, %v503_v41   ;;  %v849_v1 = vld [vmem:[%s1170_s2 + $0x38] sm:$0xff]  }
   0xf   :  { %754 = vmatpush3.bf16.msk.msra.mxu1 %vm681_vm12, %v852_v15  ;;  %vm953_vm6 = vmpackc.low %vm111_vm3, %vm110_vm2  ;;  %v850_v2 = vld [vmem:[%s1171_s1 + $0x38] sm:$0xff]  }
  0x10   :  { %786 = vmatpush3.bf16.msk.msra.mxu0 %vm705_vm15, %v852_v15  ;;  %755 = vmatprep.subr.msk.bf16.mxu1 %vm931_vm0, %v852_v15  ;;  %vm957_vm7 = vmpackc.low %vm51_vm5, %vm50_vm4  ;;  %vm115_vm15 = vcmp.eq.s32.totalorder %v899_v11, %v35_v25  ;;  %vm116_vm4 = vcmp.eq.s32.totalorder %v899_v11, %v36_v28  ;;  %vm117_vm5 = vcmp.eq.s32.totalorder %v899_v11, %v37_v29 }
  0x11   :  { %787 = vmatprep.subr.msk.bf16.mxu0 %vm935_vm1, %v852_v15  ;;  %vm979_vm12 = vmpackc.low %vm113_vm9, %vm112_vm8  ;;  %546 = vperm.xlu0 %833, %v504_v43  }
  0x12   :  { %vm983_vm13 = vmpackc.low %vm53_vm11, %vm52_vm10  ;;  %vm118_vm10 = vcmp.eq.s32.totalorder %v899_v11, %v38_v34  ;;  %vm119_vm11 = vcmp.eq.s32.totalorder %v899_v11, %v39_v35  ;;  %551 = vperm.xlu1 %834, %v505_v44  }
  0x13   :  { %756 = vmatpush3.bf16.msk.msra.mxu1 %vm931_vm0, %v852_v15  ;;  %vm54_vm0 = vcmp.eq.s32.totalorder %v901_v12, %v34_v24  ;;  %vm1008_vm2 = vmpackc.low %vm115_vm15, %vm114_vm14 }
  0x14   :  { %788 = vmatpush3.bf16.msk.msra.mxu0 %vm935_vm1, %v852_v15  ;;  %757 = vmatprep.subr.msk.bf16.mxu1 %vm953_vm6, %v852_v15  ;;  %vm55_vm1 = vcmp.eq.s32.totalorder %v901_v12, %v35_v25  ;;  %vm1043_vm8 = vmpackc.low %vm117_vm5, %vm116_vm4 }
  0x15   :  { %789 = vmatprep.subr.msk.bf16.mxu0 %vm957_vm7, %v852_v15  ;;  %vm1015_vm3 = vmpackc.low %vm55_vm1, %vm54_vm0  ;;  %556 = vperm.xlu0 %833, %v506_v46  }
  0x16   :  { %vm693_vm14 = vmpackc.low %vm119_vm11, %vm118_vm10  ;;  %561 = vperm.xlu1 %834, %v507_v49  }
  0x17   :  { %758 = vmatpush3.bf16.msk.msra.mxu1 %vm953_vm6, %v852_v15  ;;  %vm56_vm6 = vcmp.eq.s32.totalorder %v901_v12, %v36_v28 }
  0x18   :  { %790 = vmatpush3.bf16.msk.msra.mxu0 %vm957_vm7, %v852_v15  ;;  %759 = vmatprep.subr.msk.bf16.mxu1 %vm979_vm12, %v852_v15  ;;  %vm57_vm7 = vcmp.eq.s32.totalorder %v901_v12, %v37_v29 }
  0x19   :  { %791 = vmatprep.subr.msk.bf16.mxu0 %vm983_vm13, %v852_v15  ;;  %vm1047_vm9 = vmpackc.low %vm57_vm7, %vm56_vm6  ;;  %566 = vperm.xlu0 %833, %v508_v51  }
  0x1a   :  { %571 = vperm.xlu1 %834, %v509_v52  }
  0x1b   :  { %760 = vmatpush3.bf16.msk.msra.mxu1 %vm979_vm12, %v852_v15  ;;  %vm58_vm12 = vcmp.eq.s32.totalorder %v901_v12, %v38_v34 }
  0x1c   :  { %792 = vmatpush3.bf16.msk.msra.mxu0 %vm983_vm13, %v852_v15  ;;  %761 = vmatprep.subr.msk.bf16.mxu1 %vm1008_vm2, %v852_v15  ;;  %vm59_vm13 = vcmp.eq.s32.totalorder %v901_v12, %v39_v35 }
  0x1d   :  { %793 = vmatprep.subr.msk.bf16.mxu0 %vm1015_vm3, %v852_v15  ;;  %vm1073_vm15 = vmpackc.low %vm59_vm13, %vm58_vm12  ;;  %576 = vperm.xlu0 %833, %v510_v54  }
  0x1e   :  { %581 = vperm.xlu1 %834, %v511_v57  }
  0x1f   :  { %762 = vmatpush3.bf16.msk.msra.mxu1 %vm1008_vm2, %v852_v15 }
  0x20   :  { %794 = vmatpush3.bf16.msk.msra.mxu0 %vm1015_vm3, %v852_v15  ;;  %763 = vmatprep.subr.msk.bf16.mxu1 %vm1043_vm8, %v852_v15 }
  0x21   :  { %795 = vmatprep.subr.msk.bf16.mxu0 %vm1047_vm9, %v852_v15  ;;  %586 = vperm.xlu0 %833, %v512_v59  }
  0x22   :  { %591 = vperm.xlu1 %834, %v513_v60  }
  0x23   :  { %764 = vmatpush3.bf16.msk.msra.mxu1 %vm1043_vm8, %v852_v15 }
  0x24   :  { %796 = vmatpush3.bf16.msk.msra.mxu0 %vm1047_vm9, %v852_v15  ;;  %765 = vmatprep.subr.msk.bf16.mxu1 %vm693_vm14, %v852_v15 }
  0x25   :  { %797 = vmatprep.subr.msk.bf16.mxu0 %vm1073_vm15, %v852_v15 }
  0x27   :  { %766 = vmatpush3.bf16.msk.msra.mxu1 %vm693_vm14, %v852_v15 }
  0x28   :  { %798 = vmatpush3.bf16.msk.msra.mxu0 %vm1073_vm15, %v852_v15 }
  0x2a   :  { %768 = vmatmul.mubr.bf16.vlgmr.msra.gmra.mrb[0].mxu1 %v837_v45 }
  0x2b   :  { %800 = vmatmul.mubr.bf16.vlgmr.msra.gmra.mrb[0].mxu0 %v838_v47  ;;  %771 = vmatprep.mubr.bf16.mxu1 %v839_v48 }
  0x2c   :  { %803 = vmatprep.mubr.bf16.mxu0 %v840_v50 }
  0x32   :  { %772 = vmatmul.mubr.bf16.gmra.mrb[4].mxu1 %v841_v53 }
  0x33   :  { %804 = vmatmul.mubr.bf16.gmra.mrb[4].mxu0 %v842_v55  ;;  %775 = vmatprep.mubr.bf16.mxu1 %v843_v56 }
  0x34   :  { %807 = vmatprep.mubr.bf16.mxu0 %v844_v58 }
  0x3a   :  { %776 = vmatmul.mubr.bf16.gmra.mrb[8].mxu1 %v845_v61 }
  0x3b   :  { %808 = vmatmul.mubr.bf16.gmra.mrb[8].mxu0 %v846_v62  ;;  %779 = vmatprep.mubr.bf16.mxu1 %v847_v63 }
  0x3c   :  { %811 = vmatprep.mubr.bf16.mxu0 %v848_v0 }
  0x42   :  { %780 = vmatmul.mubr.bf16.gmra.mrb[12].mxu1 %v849_v1 }
  0x43   :  { %812 = vmatmul.mubr.bf16.gmra.mrb[12].mxu0 %v850_v2 }
  0x81   :  { %v527_v4 = vpop.permute.xlu1 %526 }
  0x84   :  { %v517_v3 = vpop.permute.xlu0 %516 }
  0x85   :  { %v532_v6 = vpop.permute.xlu1 %531 }
  0x88   :  { %v522_v5 = vpop.permute.xlu0 %521 }
  0x8c   :  { %v537_v7 = vpop.permute.xlu0 %536 }
  0x8d   :  { %v542_v8 = vpop.permute.xlu1 %541 }
  0x90   :  { %v547_v22 = vpop.permute.xlu0 %546 }
  0x91   :  { %v552_v25 = vpop.permute.xlu1 %551 }
  0x94   :  { %v557_v46 = vpop.permute.xlu0 %556 }
  0x95   :  { %v562_v51 = vpop.permute.xlu1 %561 }
  0xfd   :  { %v769_v9 = vpop.f32.mrb[0].mxu1 }
  0xfe   :  { %v801_v10 = vpop.f32.mrb[0].mxu0  ;;  %v274_v11 = vpop.f32.mrb[1].mxu1 }
  0xff   :  { %v428_v12 = vadd.f32 %v801_v10, %v769_v9  ;;  %v419_v13 = vpop.f32.mrb[1].mxu0  ;;  %v770_v14 = vpop.f32.mrb[2].mxu1 }
 0x100   :  { %v420_v15 = vadd.f32 %v419_v13, %v274_v11  ;;  %v802_v16 = vpop.f32.mrb[2].mxu0  ;;  %v277_v17 = vpop.f32.mrb[3].mxu1 }
 0x101   :  { %v431_v18 = vadd.f32 %v802_v16, %v770_v14  ;;  %v422_v19 = vpop.f32.mrb[3].mxu0  ;;  %v484_v23 = vmax.f32 %v428_v12, 0.0  ;;  %v567_v9 = vpop.permute.xlu0 %566 }
 0x102   :  { %v482_v20 = vmax.f32 %v420_v15, 0.0  ;;  %v423_v21 = vadd.f32 %v422_v19, %v277_v17  ;;  %v572_v13 = vpop.permute.xlu1 %571 }
 0x103   :  { %v485_v28 = vmax.f32 %v431_v18, 0.0  ;;  %v596_v35 = vmul.f32 %v527_v4, %v484_v23 }
 0x104   :  { %v483_v24 = vmax.f32 %v423_v21, 0.0  ;;  %v594_v27 = vmul.f32 %v517_v3, %v482_v20 }
 0x105   :  { %v773_v26 = vpop.f32.mrb[4].mxu1  ;;  %v597_v42 = vmul.f32 %v532_v6, %v485_v28  ;;  %v577_v28 = vpop.permute.xlu0 %576 }
 0x106   :  { %v595_v29 = vmul.f32 %v522_v5, %v483_v24  ;;  %v805_v30 = vpop.f32.mrb[4].mxu0  ;;  %v290_v31 = vpop.f32.mrb[5].mxu1 }
 0x107   :  { %v444_v32 = vadd.f32 %v805_v30, %v773_v26  ;;  %v435_v33 = vpop.f32.mrb[5].mxu0  ;;  %v774_v34 = vpop.f32.mrb[6].mxu1 }
 0x108   :  { %v610_v36 = vadd.f32 %v595_v29, %v594_v27  ;;  %v436_v37 = vadd.f32 %v435_v33, %v290_v31  ;;  %v806_v38 = vpop.f32.mrb[6].mxu0  ;;  %v293_v39 = vpop.f32.mrb[7].mxu1 }
 0x109   :  { %v447_v40 = vadd.f32 %v806_v38, %v774_v34  ;;  %v438_v41 = vpop.f32.mrb[7].mxu0  ;;  %v488_v47 = vmax.f32 %v444_v32, 0.0 }
 0x10a   :  { %v611_v43 = vadd.f32 %v610_v36, %v596_v35  ;;  %v486_v44 = vmax.f32 %v436_v37, 0.0  ;;  %v439_v45 = vadd.f32 %v438_v41, %v293_v39  ;;  %v582_v35 = vpop.permute.xlu1 %581 }
 0x10b   :  { %v489_v54 = vmax.f32 %v447_v40, 0.0  ;;  %v600_v61 = vmul.f32 %v547_v22, %v488_v47 }
 0x10c   :  { %v598_v48 = vmul.f32 %v537_v7, %v486_v44  ;;  %v612_v49 = vadd.f32 %v611_v43, %v597_v42  ;;  %v487_v50 = vmax.f32 %v439_v45, 0.0  ;;  %v587_v43 = vpop.permute.xlu0 %586 }
 0x10d   :  { %v777_v52 = vpop.f32.mrb[8].mxu1  ;;  %v601_v4 = vmul.f32 %v552_v25, %v489_v54 }
 0x10e   :  { %v613_v53 = vadd.f32 %v612_v49, %v598_v48  ;;  %v599_v55 = vmul.f32 %v542_v8, %v487_v50  ;;  %v809_v56 = vpop.f32.mrb[8].mxu0  ;;  %v306_v57 = vpop.f32.mrb[9].mxu1 }
 0x10f   :  { %v460_v58 = vadd.f32 %v809_v56, %v777_v52  ;;  %v451_v59 = vpop.f32.mrb[9].mxu0  ;;  %v778_v60 = vpop.f32.mrb[10].mxu1 }
 0x110   :  { %v614_v62 = vadd.f32 %v613_v53, %v599_v55  ;;  %v452_v63 = vadd.f32 %v451_v59, %v306_v57  ;;  %v810_v0 = vpop.f32.mrb[10].mxu0  ;;  %v309_v1 = vpop.f32.mrb[11].mxu1  ;;  %v632_v55 = vstv %s1173_s4 }
 0x111   :  { %v463_v2 = vadd.f32 %v810_v0, %v778_v60  ;;  %v454_v3 = vpop.f32.mrb[11].mxu0  ;;  %v492_v10 = vmax.f32 %v460_v58, 0.0 }
 0x112   :  { %v615_v5 = vadd.f32 %v614_v62, %v600_v61  ;;  %v490_v6 = vmax.f32 %v452_v63, 0.0  ;;  %v455_v7 = vadd.f32 %v454_v3, %v309_v1 }
 0x113   :  { %v493_v16 = vmax.f32 %v463_v2, 0.0  ;;  %v604_v23 = vmul.f32 %v567_v9, %v492_v10 }
 0x114   :  { %v602_v11 = vmul.f32 %v557_v46, %v490_v6  ;;  %v616_v8 = vadd.f32 %v615_v5, %v601_v4  ;;  %v491_v12 = vmax.f32 %v455_v7, 0.0  ;;  %v592_v46 = vpop.permute.xlu1 %591 }
 0x115   :  { %v781_v14 = vpop.f32.mrb[12].mxu1  ;;  %v605_v31 = vmul.f32 %v572_v13, %v493_v16 }
 0x116   :  { %v617_v15 = vadd.f32 %v616_v8, %v602_v11  ;;  %v603_v17 = vmul.f32 %v562_v51, %v491_v12  ;;  %v813_v18 = vpop.f32.mrb[12].mxu0  ;;  %v322_v19 = vpop.f32.mrb[13].mxu1 }
 0x117   :  { %v476_v20 = vadd.f32 %v813_v18, %v781_v14  ;;  %v467_v21 = vpop.f32.mrb[13].mxu0  ;;  %v782_v22 = vpop.f32.mrb[14].mxu1 }
 0x118   :  { %v618_v24 = vadd.f32 %v617_v15, %v603_v17  ;;  %v468_v25 = vadd.f32 %v467_v21, %v322_v19  ;;  %v814_v26 = vpop.f32.mrb[14].mxu0  ;;  %v325_v27 = vpop.f32.mrb[15].mxu1 }
 0x119   :  { %v479_v29 = vadd.f32 %v814_v26, %v782_v22  ;;  %v470_v30 = vpop.f32.mrb[15].mxu0  ;;  %v496_v36 = vmax.f32 %v476_v20, 0.0 }
 0x11a   :  { %v619_v32 = vadd.f32 %v618_v24, %v604_v23  ;;  %v494_v33 = vmax.f32 %v468_v25, 0.0  ;;  %v471_v34 = vadd.f32 %v470_v30, %v325_v27 }
 0x11b   :  { %v497_v41 = vmax.f32 %v479_v29, 0.0  ;;  %v608_v44 = vmul.f32 %v587_v43, %v496_v36 }
 0x11c   :  { %v606_v37 = vmul.f32 %v577_v28, %v494_v33  ;;  %v620_v38 = vadd.f32 %v619_v32, %v605_v31  ;;  %v495_v39 = vmax.f32 %v471_v34, 0.0 }
 0x11d   :  { %v609_v47 = vmul.f32 %v592_v46, %v497_v41 }
 0x11e   :  { %v621_v40 = vadd.f32 %v620_v38, %v606_v37  ;;  %v607_v42 = vmul.f32 %v582_v35, %v495_v39 }
 0x120   :  { %v622_v45 = vadd.f32 %v621_v40, %v607_v42 }
 0x122   :  { %v623_v48 = vadd.f32 %v622_v45, %v608_v44 }
 0x124   :  { %v624_v49 = vadd.f32 %v623_v48, %v609_v47 }
 0x126   :  { %v625_v50 = vrot.slane %v624_v49, 4 }
 0x128   :  { %v626_v51 = vadd.f32 %v625_v50, %v624_v49 }
 0x12a   :  { %v627_v52 = vrot.slane %v626_v51, 2 }
 0x12c   :  { %v628_v53 = vadd.f32 %v627_v52, %v626_v51 }
 0x12e   :  { %v629_v54 = vrot.slane %v628_v53, 1 }
 0x130   :  { %v630_v56 = vadd.f32 %v629_v54, %v628_v53 }
 0x132   :  { %v633_v57 = vadd.f32 %v632_v55, %v630_v56 }
 0x134   :  { %634 = vst [vmem:[%s1174_s5] sm:$0x1] %v633_v57 }

</bundles_post_ra>
